<compile_context>
chip_gen: v5e
topology: v5e:2x2
jax: 0.10.0
libtpu: 0.0.40
codegen_flags: <defaults>
</compile_context>

<pallas_src>
import jax
import jax.numpy as jnp
from jax import lax
from jax.experimental import pallas as pl
from jax.experimental.pallas import tpu as pltpu

INPUT_SIZE = 5
HIDDEN = 64


def lstm_kernel(gx_ref, whh_ref, out_ref, h_ref, c_ref):
    # gx_ref : (Tt, Bc, 4H) pre-scaled input projection + bias (f32), streamed
    # whh_ref: (H, 4H)      W_hh^T, gate cols [f, i, o, g], sigmoid cols * 0.5 (bf16)
    # out_ref: (Bc, H)      last hidden state (written on final time block)
    # h_ref  : (Bc, H)      persistent hidden-state scratch (f32)
    # c_ref  : (Bc, H)      persistent cell-state scratch (f32)
    t_blk = pl.program_id(1)
    Tt = gx_ref.shape[0]
    H = whh_ref.shape[0]

    @pl.when(t_blk == 0)
    def _():
        h_ref[...] = jnp.zeros_like(h_ref)
        c_ref[...] = jnp.zeros_like(c_ref)

    whh = whh_ref[...]  # loaded once per block, resident across steps

    # Activation epilogue constants: sigmoid gates (f,i,o) -> 0.5*tanh(.)+0.5,
    # tanh gate (g) -> 1.0*tanh(.)+0.0.  Hoisted outside the recurrence.
    mul = jnp.concatenate([jnp.full((1, 3 * H), 0.5, jnp.float32),
                           jnp.full((1, H), 1.0, jnp.float32)], axis=-1)
    add = jnp.concatenate([jnp.full((1, 3 * H), 0.5, jnp.float32),
                           jnp.zeros((1, H), jnp.float32)], axis=-1)

    def step(i, carry):
        h, c = carry
        gates = gx_ref[i] + jnp.dot(
            h.astype(whh.dtype), whh, preferred_element_type=jnp.float32
        )  # (Bc, 4H), gate order [f, i, o, g], sigmoid gates pre-scaled by 0.5
        act = jnp.tanh(gates) * mul + add     # single full-slab EUP tanh
        f = act[:, 0 * H:1 * H]
        i_g = act[:, 1 * H:2 * H]
        o = act[:, 2 * H:3 * H]
        g = act[:, 3 * H:4 * H]
        c_new = f * c + i_g * g
        h_new = o * jnp.tanh(c_new)
        return (h_new, c_new)

    h, c = lax.fori_loop(0, Tt, step, (h_ref[...], c_ref[...]),
                         unroll=min(Tt, 8))
    h_ref[...] = h
    c_ref[...] = c

    @pl.when(t_blk == pl.num_programs(1) - 1)
    def _():
        out_ref[...] = h.astype(out_ref.dtype)


def _prepack(params):
    """Transpose weights, fold biases, reorder gates, fold sigmoid 0.5 scale."""
    w_ih, w_hh, b_ih, b_hh, fc_w, fc_b = params
    H = HIDDEN
    # PyTorch LSTM row order is [i, f, g, o]; reorder to [f, i, o, g].
    perm = jnp.concatenate([
        jnp.arange(H, 2 * H),      # f
        jnp.arange(0, H),          # i
        jnp.arange(3 * H, 4 * H),  # o
        jnp.arange(2 * H, 3 * H),  # g
    ])
    # Fold the 0.5 of sigmoid(x) = 0.5*tanh(0.5*x) + 0.5 into the sigmoid-gate
    # weights/bias so the kernel does one full-slab tanh per step.
    scale = jnp.concatenate([jnp.full((3 * H, 1), 0.5, jnp.float32),
                             jnp.ones((H, 1), jnp.float32)], axis=0)
    w_ih_r = w_ih[perm].astype(jnp.float32) * scale
    w_hh_r = w_hh[perm].astype(jnp.float32) * scale
    b = ((b_ih + b_hh)[perm].astype(jnp.float32) * scale[:, 0]).reshape(1, 4 * H)
    wih_t = jnp.transpose(w_ih_r)                       # (5, 4H) f32
    whh_t = jnp.transpose(w_hh_r).astype(jnp.bfloat16)  # (H, 4H) bf16
    fcw_t = jnp.transpose(fc_w).astype(jnp.float32)     # (H, 1)
    fcb = fc_b.reshape(1, 1).astype(jnp.float32)        # (1, 1)
    return wih_t, whh_t, b, fcw_t, fcb


def _choose_time_tile(T, cap=32):
    """Largest divisor of T that is <= cap (so no time padding is needed)."""
    if T <= cap:
        return T
    for tt in range(cap, 0, -1):
        if T % tt == 0:
            return tt
    return 1


def stock_lstm_forward(x_btd, params):
    """x_btd: (B, T, 5) float32, batch_first (PyTorch convention)."""
    B, T, D = x_btd.shape
    assert D == INPUT_SIZE
    H = HIDDEN
    wih_t, whh_t, b, fcw_t, fcb = _prepack(params)

    # Batch blocking: pad to the f32 sublane tile (8); prefer >= 2 blocks once
    # there are enough rows (keeps both v7x TensorCores busy), cap 128 rows/blk.
    B_pad = max(8, ((B + 7) // 8) * 8)
    if B_pad > 8:
        Bc = min(128, max(8, ((B_pad // 2) // 8) * 8))
        B_pad = ((B_pad + Bc - 1) // Bc) * Bc
    else:
        Bc = B_pad
    if B_pad != B:
        x_btd = jnp.pad(x_btd, ((0, B_pad - B), (0, 0), (0, 0)))

    # Time-parallel input projection in XLA (off the serial path), time-major.
    x_tbd = jnp.transpose(x_btd, (1, 0, 2))                      # (T, B_pad, 5)
    gx = (jnp.einsum('tbd,dg->tbg', x_tbd, wih_t,
                     preferred_element_type=jnp.float32) + b)    # (T, B_pad, 4H)

    Tt = _choose_time_tile(T)
    grid = (B_pad // Bc, T // Tt)

    h_last = pl.pallas_call(
        lstm_kernel,
        out_shape=jax.ShapeDtypeStruct((B_pad, H), jnp.float32),
        grid=grid,
        in_specs=[
            pl.BlockSpec((Tt, Bc, 4 * H), lambda bi, ti: (ti, bi, 0)),
            pl.BlockSpec((H, 4 * H), lambda bi, ti: (0, 0)),
        ],
        out_specs=pl.BlockSpec((Bc, H), lambda bi, ti: (bi, 0)),
        scratch_shapes=[pltpu.VMEM((Bc, H), jnp.float32),   # h state
                        pltpu.VMEM((Bc, H), jnp.float32)],  # c state
        compiler_params=pltpu.CompilerParams(
            dimension_semantics=("parallel", "arbitrary")),
    )(gx, whh_t)

    # One-off epilogue in XLA: fc + leaky_relu (lane-dense kernel output).
    y = h_last[:B] @ fcw_t + fcb
    return jnp.where(y > 0.0, y, 0.01 * y)


def init_params(key):
    """Deterministic init matching PyTorch shapes (uniform(-k, k), k=1/sqrt(H))."""
    k_lstm = 1.0 / jnp.sqrt(jnp.float32(HIDDEN))
    k_fc = 1.0 / jnp.sqrt(jnp.float32(HIDDEN))
    ks = jax.random.split(key, 6)
    w_ih = jax.random.uniform(ks[0], (4 * HIDDEN, INPUT_SIZE), jnp.float32,
                              -k_lstm, k_lstm)
    w_hh = jax.random.uniform(ks[1], (4 * HIDDEN, HIDDEN), jnp.float32,
                              -k_lstm, k_lstm)
    b_ih = jax.random.uniform(ks[2], (4 * HIDDEN,), jnp.float32, -k_lstm, k_lstm)
    b_hh = jax.random.uniform(ks[3], (4 * HIDDEN,), jnp.float32, -k_lstm, k_lstm)
    fc_w = jax.random.uniform(ks[4], (1, HIDDEN), jnp.float32, -k_fc, k_fc)
    fc_b = jax.random.uniform(ks[5], (1,), jnp.float32, -k_fc, k_fc)
    return (w_ih, w_hh, b_ih, b_hh, fc_w, fc_b)


def reference_forward(x_btd, params):
    """Pure-JAX f32 reference (same math as PyTorch)."""
    w_ih, w_hh, b_ih, b_hh, fc_w, fc_b = params
    B, T, _ = x_btd.shape
    H = HIDDEN
    h = jnp.zeros((B, H), jnp.float32)
    c = jnp.zeros((B, H), jnp.float32)
    for t in range(T):
        gates = x_btd[:, t, :] @ w_ih.T + b_ih + h @ w_hh.T + b_hh
        i = jax.nn.sigmoid(gates[:, 0 * H:1 * H])
        f = jax.nn.sigmoid(gates[:, 1 * H:2 * H])
        g = jnp.tanh(gates[:, 2 * H:3 * H])
        o = jax.nn.sigmoid(gates[:, 3 * H:4 * H])
        c = f * c + i * g
        h = o * jnp.tanh(c)
    y = h @ fc_w.T + fc_b
    return jnp.where(y > 0, y, 0.01 * y)


if __name__ == "__main__":
    B, T = 2, 8
    key = jax.random.PRNGKey(0)
    k_x, k_p = jax.random.split(key)
    x = jax.random.normal(k_x, (B, T, INPUT_SIZE), jnp.float32)
    params = init_params(k_p)

    out = jax.block_until_ready(stock_lstm_forward(x, params))
    ref = reference_forward(x, params)
    assert out.shape == (B, 1)
    # bf16 MXU inputs on the recurrent matmul -> loosened tolerance.
    assert jnp.allclose(out, ref, atol=2e-2, rtol=2e-2), (out, ref)
    print("KERNEL_OK")
</pallas_src>

<mosaic_0001>
module attributes {stable_mosaic.version = 11 : i64} {
  func.func @lstm_kernel(%arg0: i32, %arg1: i32, %arg2: memref<8x8x256xf32, #tpu.memory_space<vmem>>, %arg3: memref<64x256xbf16, #tpu.memory_space<vmem>>, %arg4: memref<8x64xf32, #tpu.memory_space<vmem>>, %arg5: memref<8x64xf32, #tpu.memory_space<vmem>>, %arg6: memref<8x64xf32, #tpu.memory_space<vmem>>) attributes {dimension_semantics = [#tpu.dimension_semantics<parallel>, #tpu.dimension_semantics<arbitrary>], iteration_bounds = array<i64: 1, 1>, scalar_prefetch = 0 : i64, scratch_operands = 2 : i64, tpu.core_type = #tpu.core_type<tc>, window_params = [{transform_indices = @transform_0, window_bounds = array<i64: 8, 8, 256>}, {pipeline_mode = #tpu.pipeline_mode<synchronous>, transform_indices = @transform_1, window_bounds = array<i64: 64, 256>}, {transform_indices = @transform_2, window_bounds = array<i64: 8, 64>}]} {
    %c0_i32 = arith.constant 0 : i32
    %0 = arith.cmpi eq, %arg1, %c0_i32 : i32
    %1 = arith.extui %0 : i1 to i32
    %c0_i32_0 = arith.constant 0 : i32
    %2 = arith.cmpi ne, %1, %c0_i32_0 : i32
    scf.if %2 {
      %cst_40 = arith.constant 0.000000e+00 : f32
      %177 = vector.broadcast %cst_40 : f32 to vector<8x64xf32>
      %c0_41 = arith.constant 0 : index
      %c0_42 = arith.constant 0 : index
      %178 = vector.load %arg5[%c0_41, %c0_42] : memref<8x64xf32, #tpu.memory_space<vmem>>, vector<8x64xf32>
      tpu.vector_store %arg5[%c0_41, %c0_42], %177 {strides = array<i32>} : memref<8x64xf32, #tpu.memory_space<vmem>>, vector<8x64xf32>,
      %cst_43 = arith.constant 0.000000e+00 : f32
      %179 = vector.broadcast %cst_43 : f32 to vector<8x64xf32>
      %c0_44 = arith.constant 0 : index
      %c0_45 = arith.constant 0 : index
      %180 = vector.load %arg6[%c0_44, %c0_45] : memref<8x64xf32, #tpu.memory_space<vmem>>, vector<8x64xf32>
      tpu.vector_store %arg6[%c0_44, %c0_45], %179 {strides = array<i32>} : memref<8x64xf32, #tpu.memory_space<vmem>>, vector<8x64xf32>,
    } else {
    }
    %c0 = arith.constant 0 : index
    %c0_1 = arith.constant 0 : index
    %3 = vector.load %arg3[%c0, %c0_1] : memref<64x256xbf16, #tpu.memory_space<vmem>>, vector<64x256xbf16>
    %cst = arith.constant 5.000000e-01 : f32
    %4 = vector.broadcast %cst : f32 to vector<1x192xf32>
    %cst_2 = arith.constant 1.000000e+00 : f32
    %5 = vector.broadcast %cst_2 : f32 to vector<1x64xf32>
    %6 = tpu.concatenate %4, %5 in 1 : vector<1x192xf32>, vector<1x64xf32> -> vector<1x256xf32>
    %cst_3 = arith.constant 5.000000e-01 : f32
    %7 = vector.broadcast %cst_3 : f32 to vector<1x192xf32>
    %cst_4 = arith.constant 0.000000e+00 : f32
    %8 = vector.broadcast %cst_4 : f32 to vector<1x64xf32>
    %9 = tpu.concatenate %7, %8 in 1 : vector<1x192xf32>, vector<1x64xf32> -> vector<1x256xf32>
    %c0_5 = arith.constant 0 : index
    %c0_6 = arith.constant 0 : index
    %10 = vector.load %arg5[%c0_5, %c0_6] : memref<8x64xf32, #tpu.memory_space<vmem>>, vector<8x64xf32>
    %c0_7 = arith.constant 0 : index
    %c0_8 = arith.constant 0 : index
    %11 = vector.load %arg6[%c0_7, %c0_8] : memref<8x64xf32, #tpu.memory_space<vmem>>, vector<8x64xf32>
    %c0_i32_9 = arith.constant 0 : i32
    %12 = arith.index_cast %c0_i32_9 : i32 to index
    %c0_10 = arith.constant 0 : index
    %c0_11 = arith.constant 0 : index
    %13 = vector.load %arg2[%12, %c0_10, %c0_11] : memref<8x8x256xf32, #tpu.memory_space<vmem>>, vector<1x8x256xf32>
    %14 = vector.shape_cast %13 : vector<1x8x256xf32> to vector<8x256xf32>
    %15 = arith.truncf %10 : vector<8x64xf32> to vector<8x64xbf16>
    %cst_12 = arith.constant dense<0.000000e+00> : vector<8x256xf32>
    %16 = tpu.matmul %15, %3, %cst_12 {dimension_numbers = #tpu.dot_dimension_numbers<[1], [0], [0], [1], [0, 0, 1, 1], [], []>} : vector<8x64xbf16>, vector<64x256xbf16>, vector<8x256xf32> -> vector<8x256xf32>
    %17 = arith.addf %14, %16 : vector<8x256xf32>
    %18 = math.tanh %17 : vector<8x256xf32>
    %19 = vector.broadcast %6 : vector<1x256xf32> to vector<8x256xf32>
    %20 = arith.mulf %18, %19 : vector<8x256xf32>
    %21 = vector.broadcast %9 : vector<1x256xf32> to vector<8x256xf32>
    %22 = arith.addf %20, %21 : vector<8x256xf32>
    %23 = vector.extract_strided_slice %22 {offsets = [0, 0], sizes = [8, 64], strides = [1, 1]} : vector<8x256xf32> to vector<8x64xf32>
    %24 = vector.extract_strided_slice %22 {offsets = [0, 64], sizes = [8, 64], strides = [1, 1]} : vector<8x256xf32> to vector<8x64xf32>
    %25 = vector.extract_strided_slice %22 {offsets = [0, 128], sizes = [8, 64], strides = [1, 1]} : vector<8x256xf32> to vector<8x64xf32>
    %26 = vector.extract_strided_slice %22 {offsets = [0, 192], sizes = [8, 64], strides = [1, 1]} : vector<8x256xf32> to vector<8x64xf32>
    %27 = arith.mulf %23, %11 : vector<8x64xf32>
    %28 = arith.mulf %24, %26 : vector<8x64xf32>
    %29 = arith.addf %27, %28 : vector<8x64xf32>
    %30 = math.tanh %29 : vector<8x64xf32>
    %31 = arith.mulf %25, %30 : vector<8x64xf32>
    %c1_i32 = arith.constant 1 : i32
    %32 = arith.index_cast %c1_i32 : i32 to index
    %c0_13 = arith.constant 0 : index
    %c0_14 = arith.constant 0 : index
    %33 = vector.load %arg2[%32, %c0_13, %c0_14] : memref<8x8x256xf32, #tpu.memory_space<vmem>>, vector<1x8x256xf32>
    %34 = vector.shape_cast %33 : vector<1x8x256xf32> to vector<8x256xf32>
    %35 = arith.truncf %31 : vector<8x64xf32> to vector<8x64xbf16>
    %cst_15 = arith.constant dense<0.000000e+00> : vector<8x256xf32>
    %36 = tpu.matmul %35, %3, %cst_15 {dimension_numbers = #tpu.dot_dimension_numbers<[1], [0], [0], [1], [0, 0, 1, 1], [], []>} : vector<8x64xbf16>, vector<64x256xbf16>, vector<8x256xf32> -> vector<8x256xf32>
    %37 = arith.addf %34, %36 : vector<8x256xf32>
    %38 = math.tanh %37 : vector<8x256xf32>
    %39 = vector.broadcast %6 : vector<1x256xf32> to vector<8x256xf32>
    %40 = arith.mulf %38, %39 : vector<8x256xf32>
    %41 = vector.broadcast %9 : vector<1x256xf32> to vector<8x256xf32>
    %42 = arith.addf %40, %41 : vector<8x256xf32>
    %43 = vector.extract_strided_slice %42 {offsets = [0, 0], sizes = [8, 64], strides = [1, 1]} : vector<8x256xf32> to vector<8x64xf32>
    %44 = vector.extract_strided_slice %42 {offsets = [0, 64], sizes = [8, 64], strides = [1, 1]} : vector<8x256xf32> to vector<8x64xf32>
    %45 = vector.extract_strided_slice %42 {offsets = [0, 128], sizes = [8, 64], strides = [1, 1]} : vector<8x256xf32> to vector<8x64xf32>
    %46 = vector.extract_strided_slice %42 {offsets = [0, 192], sizes = [8, 64], strides = [1, 1]} : vector<8x256xf32> to vector<8x64xf32>
    %47 = arith.mulf %43, %29 : vector<8x64xf32>
    %48 = arith.mulf %44, %46 : vector<8x64xf32>
    %49 = arith.addf %47, %48 : vector<8x64xf32>
    %50 = math.tanh %49 : vector<8x64xf32>
    %51 = arith.mulf %45, %50 : vector<8x64xf32>
    %c2_i32 = arith.constant 2 : i32
    %52 = arith.index_cast %c2_i32 : i32 to index
    %c0_16 = arith.constant 0 : index
    %c0_17 = arith.constant 0 : index
    %53 = vector.load %arg2[%52, %c0_16, %c0_17] : memref<8x8x256xf32, #tpu.memory_space<vmem>>, vector<1x8x256xf32>
    %54 = vector.shape_cast %53 : vector<1x8x256xf32> to vector<8x256xf32>
    %55 = arith.truncf %51 : vector<8x64xf32> to vector<8x64xbf16>
    %cst_18 = arith.constant dense<0.000000e+00> : vector<8x256xf32>
    %56 = tpu.matmul %55, %3, %cst_18 {dimension_numbers = #tpu.dot_dimension_numbers<[1], [0], [0], [1], [0, 0, 1, 1], [], []>} : vector<8x64xbf16>, vector<64x256xbf16>, vector<8x256xf32> -> vector<8x256xf32>
    %57 = arith.addf %54, %56 : vector<8x256xf32>
    %58 = math.tanh %57 : vector<8x256xf32>
    %59 = vector.broadcast %6 : vector<1x256xf32> to vector<8x256xf32>
    %60 = arith.mulf %58, %59 : vector<8x256xf32>
    %61 = vector.broadcast %9 : vector<1x256xf32> to vector<8x256xf32>
    %62 = arith.addf %60, %61 : vector<8x256xf32>
    %63 = vector.extract_strided_slice %62 {offsets = [0, 0], sizes = [8, 64], strides = [1, 1]} : vector<8x256xf32> to vector<8x64xf32>
    %64 = vector.extract_strided_slice %62 {offsets = [0, 64], sizes = [8, 64], strides = [1, 1]} : vector<8x256xf32> to vector<8x64xf32>
    %65 = vector.extract_strided_slice %62 {offsets = [0, 128], sizes = [8, 64], strides = [1, 1]} : vector<8x256xf32> to vector<8x64xf32>
    %66 = vector.extract_strided_slice %62 {offsets = [0, 192], sizes = [8, 64], strides = [1, 1]} : vector<8x256xf32> to vector<8x64xf32>
    %67 = arith.mulf %63, %49 : vector<8x64xf32>
    %68 = arith.mulf %64, %66 : vector<8x64xf32>
    %69 = arith.addf %67, %68 : vector<8x64xf32>
    %70 = math.tanh %69 : vector<8x64xf32>
    %71 = arith.mulf %65, %70 : vector<8x64xf32>
    %c3_i32 = arith.constant 3 : i32
    %72 = arith.index_cast %c3_i32 : i32 to index
    %c0_19 = arith.constant 0 : index
    %c0_20 = arith.constant 0 : index
    %73 = vector.load %arg2[%72, %c0_19, %c0_20] : memref<8x8x256xf32, #tpu.memory_space<vmem>>, vector<1x8x256xf32>
    %74 = vector.shape_cast %73 : vector<1x8x256xf32> to vector<8x256xf32>
    %75 = arith.truncf %71 : vector<8x64xf32> to vector<8x64xbf16>
    %cst_21 = arith.constant dense<0.000000e+00> : vector<8x256xf32>
    %76 = tpu.matmul %75, %3, %cst_21 {dimension_numbers = #tpu.dot_dimension_numbers<[1], [0], [0], [1], [0, 0, 1, 1], [], []>} : vector<8x64xbf16>, vector<64x256xbf16>, vector<8x256xf32> -> vector<8x256xf32>
    %77 = arith.addf %74, %76 : vector<8x256xf32>
    %78 = math.tanh %77 : vector<8x256xf32>
    %79 = vector.broadcast %6 : vector<1x256xf32> to vector<8x256xf32>
    %80 = arith.mulf %78, %79 : vector<8x256xf32>
    %81 = vector.broadcast %9 : vector<1x256xf32> to vector<8x256xf32>
    %82 = arith.addf %80, %81 : vector<8x256xf32>
    %83 = vector.extract_strided_slice %82 {offsets = [0, 0], sizes = [8, 64], strides = [1, 1]} : vector<8x256xf32> to vector<8x64xf32>
    %84 = vector.extract_strided_slice %82 {offsets = [0, 64], sizes = [8, 64], strides = [1, 1]} : vector<8x256xf32> to vector<8x64xf32>
    %85 = vector.extract_strided_slice %82 {offsets = [0, 128], sizes = [8, 64], strides = [1, 1]} : vector<8x256xf32> to vector<8x64xf32>
    %86 = vector.extract_strided_slice %82 {offsets = [0, 192], sizes = [8, 64], strides = [1, 1]} : vector<8x256xf32> to vector<8x64xf32>
    %87 = arith.mulf %83, %69 : vector<8x64xf32>
    %88 = arith.mulf %84, %86 : vector<8x64xf32>
    %89 = arith.addf %87, %88 : vector<8x64xf32>
    %90 = math.tanh %89 : vector<8x64xf32>
    %91 = arith.mulf %85, %90 : vector<8x64xf32>
    %c4_i32 = arith.constant 4 : i32
    %92 = arith.index_cast %c4_i32 : i32 to index
    %c0_22 = arith.constant 0 : index
    %c0_23 = arith.constant 0 : index
    %93 = vector.load %arg2[%92, %c0_22, %c0_23] : memref<8x8x256xf32, #tpu.memory_space<vmem>>, vector<1x8x256xf32>
    %94 = vector.shape_cast %93 : vector<1x8x256xf32> to vector<8x256xf32>
    %95 = arith.truncf %91 : vector<8x64xf32> to vector<8x64xbf16>
    %cst_24 = arith.constant dense<0.000000e+00> : vector<8x256xf32>
    %96 = tpu.matmul %95, %3, %cst_24 {dimension_numbers = #tpu.dot_dimension_numbers<[1], [0], [0], [1], [0, 0, 1, 1], [], []>} : vector<8x64xbf16>, vector<64x256xbf16>, vector<8x256xf32> -> vector<8x256xf32>
    %97 = arith.addf %94, %96 : vector<8x256xf32>
    %98 = math.tanh %97 : vector<8x256xf32>
    %99 = vector.broadcast %6 : vector<1x256xf32> to vector<8x256xf32>
    %100 = arith.mulf %98, %99 : vector<8x256xf32>
    %101 = vector.broadcast %9 : vector<1x256xf32> to vector<8x256xf32>
    %102 = arith.addf %100, %101 : vector<8x256xf32>
    %103 = vector.extract_strided_slice %102 {offsets = [0, 0], sizes = [8, 64], strides = [1, 1]} : vector<8x256xf32> to vector<8x64xf32>
    %104 = vector.extract_strided_slice %102 {offsets = [0, 64], sizes = [8, 64], strides = [1, 1]} : vector<8x256xf32> to vector<8x64xf32>
    %105 = vector.extract_strided_slice %102 {offsets = [0, 128], sizes = [8, 64], strides = [1, 1]} : vector<8x256xf32> to vector<8x64xf32>
    %106 = vector.extract_strided_slice %102 {offsets = [0, 192], sizes = [8, 64], strides = [1, 1]} : vector<8x256xf32> to vector<8x64xf32>
    %107 = arith.mulf %103, %89 : vector<8x64xf32>
    %108 = arith.mulf %104, %106 : vector<8x64xf32>
    %109 = arith.addf %107, %108 : vector<8x64xf32>
    %110 = math.tanh %109 : vector<8x64xf32>
    %111 = arith.mulf %105, %110 : vector<8x64xf32>
    %c5_i32 = arith.constant 5 : i32
    %112 = arith.index_cast %c5_i32 : i32 to index
    %c0_25 = arith.constant 0 : index
    %c0_26 = arith.constant 0 : index
    %113 = vector.load %arg2[%112, %c0_25, %c0_26] : memref<8x8x256xf32, #tpu.memory_space<vmem>>, vector<1x8x256xf32>
    %114 = vector.shape_cast %113 : vector<1x8x256xf32> to vector<8x256xf32>
    %115 = arith.truncf %111 : vector<8x64xf32> to vector<8x64xbf16>
    %cst_27 = arith.constant dense<0.000000e+00> : vector<8x256xf32>
    %116 = tpu.matmul %115, %3, %cst_27 {dimension_numbers = #tpu.dot_dimension_numbers<[1], [0], [0], [1], [0, 0, 1, 1], [], []>} : vector<8x64xbf16>, vector<64x256xbf16>, vector<8x256xf32> -> vector<8x256xf32>
    %117 = arith.addf %114, %116 : vector<8x256xf32>
    %118 = math.tanh %117 : vector<8x256xf32>
    %119 = vector.broadcast %6 : vector<1x256xf32> to vector<8x256xf32>
    %120 = arith.mulf %118, %119 : vector<8x256xf32>
    %121 = vector.broadcast %9 : vector<1x256xf32> to vector<8x256xf32>
    %122 = arith.addf %120, %121 : vector<8x256xf32>
    %123 = vector.extract_strided_slice %122 {offsets = [0, 0], sizes = [8, 64], strides = [1, 1]} : vector<8x256xf32> to vector<8x64xf32>
    %124 = vector.extract_strided_slice %122 {offsets = [0, 64], sizes = [8, 64], strides = [1, 1]} : vector<8x256xf32> to vector<8x64xf32>
    %125 = vector.extract_strided_slice %122 {offsets = [0, 128], sizes = [8, 64], strides = [1, 1]} : vector<8x256xf32> to vector<8x64xf32>
    %126 = vector.extract_strided_slice %122 {offsets = [0, 192], sizes = [8, 64], strides = [1, 1]} : vector<8x256xf32> to vector<8x64xf32>
    %127 = arith.mulf %123, %109 : vector<8x64xf32>
    %128 = arith.mulf %124, %126 : vector<8x64xf32>
    %129 = arith.addf %127, %128 : vector<8x64xf32>
    %130 = math.tanh %129 : vector<8x64xf32>
    %131 = arith.mulf %125, %130 : vector<8x64xf32>
    %c6_i32 = arith.constant 6 : i32
    %132 = arith.index_cast %c6_i32 : i32 to index
    %c0_28 = arith.constant 0 : index
    %c0_29 = arith.constant 0 : index
    %133 = vector.load %arg2[%132, %c0_28, %c0_29] : memref<8x8x256xf32, #tpu.memory_space<vmem>>, vector<1x8x256xf32>
    %134 = vector.shape_cast %133 : vector<1x8x256xf32> to vector<8x256xf32>
    %135 = arith.truncf %131 : vector<8x64xf32> to vector<8x64xbf16>
    %cst_30 = arith.constant dense<0.000000e+00> : vector<8x256xf32>
    %136 = tpu.matmul %135, %3, %cst_30 {dimension_numbers = #tpu.dot_dimension_numbers<[1], [0], [0], [1], [0, 0, 1, 1], [], []>} : vector<8x64xbf16>, vector<64x256xbf16>, vector<8x256xf32> -> vector<8x256xf32>
    %137 = arith.addf %134, %136 : vector<8x256xf32>
    %138 = math.tanh %137 : vector<8x256xf32>
    %139 = vector.broadcast %6 : vector<1x256xf32> to vector<8x256xf32>
    %140 = arith.mulf %138, %139 : vector<8x256xf32>
    %141 = vector.broadcast %9 : vector<1x256xf32> to vector<8x256xf32>
    %142 = arith.addf %140, %141 : vector<8x256xf32>
    %143 = vector.extract_strided_slice %142 {offsets = [0, 0], sizes = [8, 64], strides = [1, 1]} : vector<8x256xf32> to vector<8x64xf32>
    %144 = vector.extract_strided_slice %142 {offsets = [0, 64], sizes = [8, 64], strides = [1, 1]} : vector<8x256xf32> to vector<8x64xf32>
    %145 = vector.extract_strided_slice %142 {offsets = [0, 128], sizes = [8, 64], strides = [1, 1]} : vector<8x256xf32> to vector<8x64xf32>
    %146 = vector.extract_strided_slice %142 {offsets = [0, 192], sizes = [8, 64], strides = [1, 1]} : vector<8x256xf32> to vector<8x64xf32>
    %147 = arith.mulf %143, %129 : vector<8x64xf32>
    %148 = arith.mulf %144, %146 : vector<8x64xf32>
    %149 = arith.addf %147, %148 : vector<8x64xf32>
    %150 = math.tanh %149 : vector<8x64xf32>
    %151 = arith.mulf %145, %150 : vector<8x64xf32>
    %c7_i32 = arith.constant 7 : i32
    %152 = arith.index_cast %c7_i32 : i32 to index
    %c0_31 = arith.constant 0 : index
    %c0_32 = arith.constant 0 : index
    %153 = vector.load %arg2[%152, %c0_31, %c0_32] : memref<8x8x256xf32, #tpu.memory_space<vmem>>, vector<1x8x256xf32>
    %154 = vector.shape_cast %153 : vector<1x8x256xf32> to vector<8x256xf32>
    %155 = arith.truncf %151 : vector<8x64xf32> to vector<8x64xbf16>
    %cst_33 = arith.constant dense<0.000000e+00> : vector<8x256xf32>
    %156 = tpu.matmul %155, %3, %cst_33 {dimension_numbers = #tpu.dot_dimension_numbers<[1], [0], [0], [1], [0, 0, 1, 1], [], []>} : vector<8x64xbf16>, vector<64x256xbf16>, vector<8x256xf32> -> vector<8x256xf32>
    %157 = arith.addf %154, %156 : vector<8x256xf32>
    %158 = math.tanh %157 : vector<8x256xf32>
    %159 = vector.broadcast %6 : vector<1x256xf32> to vector<8x256xf32>
    %160 = arith.mulf %158, %159 : vector<8x256xf32>
    %161 = vector.broadcast %9 : vector<1x256xf32> to vector<8x256xf32>
    %162 = arith.addf %160, %161 : vector<8x256xf32>
    %163 = vector.extract_strided_slice %162 {offsets = [0, 0], sizes = [8, 64], strides = [1, 1]} : vector<8x256xf32> to vector<8x64xf32>
    %164 = vector.extract_strided_slice %162 {offsets = [0, 64], sizes = [8, 64], strides = [1, 1]} : vector<8x256xf32> to vector<8x64xf32>
    %165 = vector.extract_strided_slice %162 {offsets = [0, 128], sizes = [8, 64], strides = [1, 1]} : vector<8x256xf32> to vector<8x64xf32>
    %166 = vector.extract_strided_slice %162 {offsets = [0, 192], sizes = [8, 64], strides = [1, 1]} : vector<8x256xf32> to vector<8x64xf32>
    %167 = arith.mulf %163, %149 : vector<8x64xf32>
    %168 = arith.mulf %164, %166 : vector<8x64xf32>
    %169 = arith.addf %167, %168 : vector<8x64xf32>
    %170 = math.tanh %169 : vector<8x64xf32>
    %171 = arith.mulf %165, %170 : vector<8x64xf32>
    %c8_i32 = arith.constant 8 : i32
    %c0_34 = arith.constant 0 : index
    %c0_35 = arith.constant 0 : index
    %172 = vector.load %arg5[%c0_34, %c0_35] : memref<8x64xf32, #tpu.memory_space<vmem>>, vector<8x64xf32>
    tpu.vector_store %arg5[%c0_34, %c0_35], %171 {strides = array<i32>} : memref<8x64xf32, #tpu.memory_space<vmem>>, vector<8x64xf32>,
    %c0_36 = arith.constant 0 : index
    %c0_37 = arith.constant 0 : index
    %173 = vector.load %arg6[%c0_36, %c0_37] : memref<8x64xf32, #tpu.memory_space<vmem>>, vector<8x64xf32>
    tpu.vector_store %arg6[%c0_36, %c0_37], %169 {strides = array<i32>} : memref<8x64xf32, #tpu.memory_space<vmem>>, vector<8x64xf32>,
    %c0_i32_38 = arith.constant 0 : i32
    %174 = arith.cmpi eq, %arg1, %c0_i32_38 : i32
    %175 = arith.extui %174 : i1 to i32
    %c0_i32_39 = arith.constant 0 : i32
    %176 = arith.cmpi ne, %175, %c0_i32_39 : i32
    scf.if %176 {
      %c0_40 = arith.constant 0 : index
      %c0_41 = arith.constant 0 : index
      %177 = vector.load %arg4[%c0_40, %c0_41] : memref<8x64xf32, #tpu.memory_space<vmem>>, vector<8x64xf32>
      tpu.vector_store %arg4[%c0_40, %c0_41], %171 {strides = array<i32>} : memref<8x64xf32, #tpu.memory_space<vmem>>, vector<8x64xf32>,
    } else {
    }
    return
  }
  func.func @transform_0(%arg0: i32, %arg1: i32) -> (i32, i32, i32) {
    %c0_i32 = arith.constant 0 : i32
    %c0_i32_0 = arith.constant 0 : i32
    return %arg1, %arg0, %c0_i32 : i32, i32, i32
  }
  func.func @transform_1(%arg0: i32, %arg1: i32) -> (i32, i32) {
    %c0_i32 = arith.constant 0 : i32
    %c0_i32_0 = arith.constant 0 : i32
    %c0_i32_1 = arith.constant 0 : i32
    return %c0_i32, %c0_i32_0 : i32, i32
  }
  func.func @transform_2(%arg0: i32, %arg1: i32) -> (i32, i32) {
    %c0_i32 = arith.constant 0 : i32
    %c0_i32_0 = arith.constant 0 : i32
    return %arg0, %c0_i32 : i32, i32
  }
}

</mosaic_0001>

<bundles_post_ra>
// kernel: tpu_custom_call.1
= control target key start
LH: loop header
LB: loop body
LE: loop exit
PB: predicated region body
PF: predicated region fallthrough
CT: control target
= control target key end

     0   :  { %7 = vsyncpa [#allocation5], 0  ;;  %s911_s0 = inlined_call_operand.hbm [shape: f32[8,8,256], index: 0, kind: input, shape index: {}]   ;;  %s912_s1 = inlined_call_operand.hbm [shape: bf16[64,256], index: 1, kind: input, shape index: {}]   ;;  %s913_s2 = inlined_call_operand.hbm [shape: f32[8,64], index: 2, kind: output, shape index: {}]  }
   0x1   :  { %8 = vsyncpa [#allocation8], 0 }
   0x2   :  { %9 = vsyncpa [#allocation6], 0  ;;  %s14_s11 = sshll.u32 %s911_s0, 4  ;;  %s724_s12 = smov [#allocation4]   ;;  %s15_s11 = int_to_ptr.hbm [resolvable:$true] %s14_s11 }
   0x3   :  { %s16_s13 = sshll.u32 %s724_s12, 4  ;;  %s27_s16 = sshll.u32 %s912_s1, 4  ;;  %s17_s13 = int_to_ptr.vmem [resolvable:$true] %s16_s13  ;;  %s28_s16 = int_to_ptr.hbm [resolvable:$true] %s27_s16 }
   0x4   :  { %s725_s17 = smov 256   ;;  %s726_s18 = smov 16  }
   0x5   :  { %22 = dma.hbm_to_vmem [thread:$0]  %s15_s11, 2048, %s17_s13, [#allocation5], %s725_s17, %s725_s17, %s726_s18  }
   0x6   :  { %s727_s19 = smov [#allocation7]   ;;  %s728_s21 = smov 128  }
   0x7   :  { %s29_s20 = sshll.u32 %s727_s19, 4  ;;  %s729_s22 = smov 8   ;;  %s30_s20 = int_to_ptr.vmem [resolvable:$true] %s29_s20 }
   0x8   :  { %35 = dma.hbm_to_vmem [thread:$0]  %s28_s16, 1024, %s30_s20, [#allocation8], %s728_s21, %s728_s21, %s729_s22  }
   0x9   :  { %718 = dma.done.wait [#allocation5], 2048  }
   0xa   :  { %719 = vsyncadd [#allocation5], 4294965248 }
   0xb   :  { %720 = dma.done.wait [#allocation8], 1024  }
   0xc   :  { %721 = vsyncadd [#allocation8], 4294966272  ;;  %vm49_vm0 = vcmask 523264   ;;  %v730_v0 = vmov 0.0   ;;  %v557_v1 = vld [vmem:[#allocation7 + $0x30] sm:$0xf] }
   0xd   :  { %50 = vst.msk [vmem:[#allocation2] sm:$0xff] %vm49_vm0, %v730_v0  ;;  %v586_v2 = vld [vmem:[#allocation7 + $0x34] sm:$0xf0]  ;;  %v585_v3 = vld [vmem:[#allocation7 + $0x34] sm:$0xf]  ;;  %v65_v27 = vld [vmem:[#allocation4] sm:$0xff] }
   0xe   :  { %51 = vst.msk [vmem:[#allocation3] sm:$0xff] %vm49_vm0, %v730_v0  ;;  %v760_v4 = vor.u32 %v586_v2, %v557_v1  ;;  %v559_v5 = vld [vmem:[#allocation7 + $0x38] sm:$0xf0]  ;;  %v549_v6 = vld [vmem:[#allocation7 + $0x20] sm:$0xf]  ;;  %v66_v28 = vld [vmem:[#allocation4 + $0x8] sm:$0xff] }
   0xf   :  { %v584_v7 = vld [vmem:[#allocation7 + $0x24] sm:$0xf0]  ;;  %v762_v8 = vor.u32 %v585_v3, %v559_v5  ;;  %v583_v9 = vld [vmem:[#allocation7 + $0x24] sm:$0xf]  ;;  %v551_v10 = vld [vmem:[#allocation7 + $0x28] sm:$0xf0] }
  0x10   :  { %115 = vmatpush.bf16.msra.mxu0 %v760_v4  ;;  %v765_v11 = vor.u32 %v584_v7, %v549_v6  ;;  %168 = vmatpush.bf16.msra.mxu2 %v760_v4  ;;  %v769_v12 = vor.u32 %v583_v9, %v551_v10  ;;  %v541_v13 = vld [vmem:[#allocation7 + $0x10] sm:$0xf]  ;;  %v582_v14 = vld [vmem:[#allocation7 + $0x14] sm:$0xf0]  ;;  %v581_v15 = vld [vmem:[#allocation7 + $0x14] sm:$0xf] }
  0x11   :  { %128 = vmatpush.bf16.msra.mxu1 %v762_v8  ;;  %181 = vmatpush.bf16.msra.mxu3 %v762_v8  ;;  %v543_v16 = vld [vmem:[#allocation7 + $0x18] sm:$0xf0]  ;;  %v773_v17 = vor.u32 %v582_v14, %v541_v13  ;;  %v533_v19 = vld [vmem:[#allocation7] sm:$0xf]  ;;  %v580_v20 = vld [vmem:[#allocation7 + $0x4] sm:$0xf0] }
  0x12   :  { %v777_v18 = vor.u32 %v581_v15, %v543_v16  ;;  %v579_v21 = vld [vmem:[#allocation7 + $0x4] sm:$0xf]  ;;  %v535_v22 = vld [vmem:[#allocation7 + $0x8] sm:$0xf0]  ;;  %v781_v23 = vor.u32 %v580_v20, %v533_v19  ;;  %v731_v33 = vmov 1.0   ;;  %v62_v35 = vsel %vm49_vm0, 0.5, %v730_v0 }
  0x13   :  { %v785_v25 = vor.u32 %v579_v21, %v535_v22  ;;  %v61_v34 = vsel %vm49_vm0, 0.5, %v731_v33  ;;  %v732_v36 = vmov 0.5   ;;  %v825_v42 = vperm.slane %v62_v35, 0  ;;  %s733_s0 = smov 64   ;;  %v158_v56 = vld [vmem:[#allocation4 + $0x10] sm:$0xff]  ;;  %v159_v57 = vld [vmem:[#allocation4 + $0x18] sm:$0xff] }
  0x14   :  { %116 = vmatpush.bf16.msra.mxu0 %v765_v11  ;;  %169 = vmatpush.bf16.msra.mxu2 %v765_v11  ;;  %v63_v24 = vld [vmem:[#allocation2] sm:$0xff]  ;;  %v821_v37 = vperm.slane %v732_v36, 0  ;;  %v823_v38 = vperm.slane %v61_v34, 0  ;;  %v208_v19 = vld [vmem:[#allocation4 + $0x20] sm:$0xff]  ;;  %v209_v20 = vld [vmem:[#allocation4 + $0x28] sm:$0xff]  ;;  %s734_s1 = smov [#allocation9]  }
  0x15   :  { %129 = vmatpush.bf16.msra.mxu1 %v769_v12  ;;  %182 = vmatpush.bf16.msra.mxu3 %v769_v12  ;;  %v67_v26 = vpack.c.bf16 %v63_v24, %v63_v24  ;;  %v64_v49 = vld [vmem:[#allocation3] sm:$0xff]  ;;  %s518_s23 = sshll.u32 %s734_s1, 4  ;;  %s520_s26 = sshll.u32 %s913_s2, 4  ;;  %s519_s23 = int_to_ptr.vmem [resolvable:$true] %s518_s23  ;;  %s521_s26 = int_to_ptr.hbm [resolvable:$true] %s520_s26 }
  0x18   :  { %117 = vmatpush.bf16.msra.mxu0 %v773_v17  ;;  %170 = vmatpush.bf16.msra.mxu2 %v773_v17 }
  0x19   :  { %130 = vmatpush.bf16.msra.mxu1 %v777_v18  ;;  %183 = vmatpush.bf16.msra.mxu3 %v777_v18 }
  0x1c   :  { %118 = vmatpush.bf16.msra.mxu0 %v781_v23  ;;  %171 = vmatpush.bf16.msra.mxu2 %v781_v23 }
  0x1d   :  { %131 = vmatpush.bf16.msra.mxu1 %v785_v25  ;;  %184 = vmatpush.bf16.msra.mxu3 %v785_v25 }
  0x1f   :  { %563 = vmatmul.msk.bf16.vlgmr.msra.gmra.mxu0 %vm49_vm0, %v67_v26 }
  0x20   :  { %218 = vmatpush.bf16.msrb.mxu0 %v760_v4  ;;  %268 = vmatpush.bf16.msrb.mxu2 %v760_v4 }
  0x21   :  { %231 = vmatpush.bf16.msrb.mxu1 %v762_v8  ;;  %281 = vmatpush.bf16.msrb.mxu3 %v762_v8 }
  0x22   :  { %564 = vmatmul.msk.bf16.vlgmr.msra.gmra.mxu1 %vm49_vm0, %v67_v26 }
  0x24   :  { %219 = vmatpush.bf16.msrb.mxu0 %v765_v11  ;;  %269 = vmatpush.bf16.msrb.mxu2 %v765_v11 }
  0x25   :  { %232 = vmatpush.bf16.msrb.mxu1 %v769_v12  ;;  %282 = vmatpush.bf16.msrb.mxu3 %v769_v12 }
  0x28   :  { %220 = vmatpush.bf16.msrb.mxu0 %v773_v17  ;;  %270 = vmatpush.bf16.msrb.mxu2 %v773_v17 }
  0x29   :  { %233 = vmatpush.bf16.msrb.mxu1 %v777_v18  ;;  %283 = vmatpush.bf16.msrb.mxu3 %v777_v18 }
  0x2c   :  { %221 = vmatpush.bf16.msrb.mxu0 %v781_v23  ;;  %271 = vmatpush.bf16.msrb.mxu2 %v781_v23 }
  0x2d   :  { %234 = vmatpush.bf16.msrb.mxu1 %v785_v25  ;;  %284 = vmatpush.bf16.msrb.mxu3 %v785_v25 }
  0x30   :  { %318 = vmatpush.bf16.msra.mxu0 %v760_v4 }
  0x31   :  { %331 = vmatpush.bf16.msra.mxu1 %v762_v8 }
  0x34   :  { %319 = vmatpush.bf16.msra.mxu0 %v765_v11 }
  0x35   :  { %332 = vmatpush.bf16.msra.mxu1 %v769_v12 }
  0x38   :  { %320 = vmatpush.bf16.msra.mxu0 %v773_v17 }
  0x39   :  { %333 = vmatpush.bf16.msra.mxu1 %v777_v18 }
  0x3c   :  { %321 = vmatpush.bf16.msra.mxu0 %v781_v23 }
  0x3d   :  { %334 = vmatpush.bf16.msra.mxu1 %v785_v25 }
  0x9c   :  { %v120_v29 = vpop.f32.mrf.mxu0 }
  0x9d   :  { %v137_v30 = vadd.f32 %v120_v29, %v65_v27 }
  0x9f   :  { %v133_v31 = vpop.f32.mrf.mxu1  ;;  %598 = vtanh.f32 %v137_v30 }
  0xa0   :  { %v138_v32 = vadd.f32 %v133_v31, %v66_v28 }
  0xa2   :  { %600 = vtanh.f32 %v138_v32 }
  0xa4   :  { %v122_v39 = vpop.f32.mrf.mxu0 }
  0xa5   :  { %v599_v40 = vpop.eup %598 }
  0xa6   :  { %v143_v44 = vmul.f32 %v599_v40, %v821_v37 }
  0xa7   :  { %v135_v41 = vpop.f32.mrf.mxu1 }
  0xa8   :  { %v601_v43 = vpop.eup %600  ;;  %v146_v46 = vadd.f32 %v143_v44, %v821_v37 }
  0xa9   :  { %v144_v45 = vmul.f32 %v601_v43, %v823_v38 }
  0xaa   :  { %v148_v50 = vmul.f32 %v146_v46, %v64_v49 }
  0xab   :  { %v147_v47 = vadd.f32 %v825_v42, %v144_v45  ;;  %v258_v45 = vld [vmem:[#allocation4 + $0x30] sm:$0xff] }
  0xad   :  { %v149_v48 = vmul.f32 %v147_v47, %v146_v46  ;;  %v259_v46 = vld [vmem:[#allocation4 + $0x38] sm:$0xff] }
  0xaf   :  { %151 = vrot.lane.b32.xlu0 %v149_v48, %s733_s0 }
 0x121   :  { %v152_v51 = vpop.permute.xlu0 %151 }
 0x122   :  { %v154_v52 = vadd.f32 %v152_v51, %v148_v50 }
 0x124   :  { %602 = vtanh.f32 %v154_v52 }
 0x12a   :  { %v603_v53 = vpop.eup %602 }
 0x12b   :  { %v156_v54 = vmul.f32 %v603_v53, %v147_v47 }
 0x12d   :  { %v160_v55 = vpack.c.bf16 %v156_v54, %v156_v54 }
 0x12f   :  { %565 = vmatmul.msk.bf16.vlgmr.msra.gmra.mxu2 %vm49_vm0, %v160_v55  ;;  %566 = vmatmul.msk.bf16.vlgmr.msra.gmra.mxu3 %vm49_vm0, %v160_v55 }
 0x130   :  { %368 = vmatpush.bf16.msra.mxu2 %v760_v4  ;;  %381 = vmatpush.bf16.msra.mxu3 %v762_v8 }
 0x134   :  { %369 = vmatpush.bf16.msra.mxu2 %v765_v11  ;;  %382 = vmatpush.bf16.msra.mxu3 %v769_v12 }
 0x138   :  { %370 = vmatpush.bf16.msra.mxu2 %v773_v17  ;;  %383 = vmatpush.bf16.msra.mxu3 %v777_v18 }
 0x13c   :  { %371 = vmatpush.bf16.msra.mxu2 %v781_v23  ;;  %384 = vmatpush.bf16.msra.mxu3 %v785_v25 }
 0x1b2   :  { %v173_v58 = vpop.f32.mrf.mxu2  ;;  %v186_v59 = vpop.f32.mrf.mxu3 }
 0x1b3   :  { %v190_v60 = vadd.f32 %v173_v58, %v158_v56  ;;  %v191_v61 = vadd.f32 %v186_v59, %v159_v57  ;;  %v308_v58 = vld [vmem:[#allocation4 + $0x40] sm:$0xff]  ;;  %v309_v59 = vld [vmem:[#allocation4 + $0x48] sm:$0xff] }
 0x1b5   :  { %604 = vtanh.f32 %v190_v60 }
 0x1b6   :  { %606 = vtanh.f32 %v191_v61 }
 0x1ba   :  { %v175_v62 = vpop.f32.mrf.mxu2  ;;  %v188_v63 = vpop.f32.mrf.mxu3 }
 0x1bb   :  { %v605_v0 = vpop.eup %604 }
 0x1bc   :  { %v607_v1 = vpop.eup %606  ;;  %v194_v2 = vmul.f32 %v605_v0, %v821_v37 }
 0x1bd   :  { %v195_v3 = vmul.f32 %v607_v1, %v823_v38 }
 0x1be   :  { %v196_v5 = vadd.f32 %v194_v2, %v821_v37 }
 0x1bf   :  { %v197_v6 = vadd.f32 %v195_v3, %v825_v42 }
 0x1c0   :  { %v198_v9 = vmul.f32 %v196_v5, %v154_v52 }
 0x1c1   :  { %v199_v7 = vmul.f32 %v197_v6, %v196_v5 }
 0x1c3   :  { %201 = vrot.lane.b32.xlu0 %v199_v7, %s733_s0 }
 0x235   :  { %v202_v10 = vpop.permute.xlu0 %201 }
 0x236   :  { %v204_v13 = vadd.f32 %v202_v10, %v198_v9 }
 0x238   :  { %608 = vtanh.f32 %v204_v13 }
 0x23e   :  { %v609_v14 = vpop.eup %608 }
 0x23f   :  { %v206_v15 = vmul.f32 %v609_v14, %v197_v6 }
 0x241   :  { %v210_v16 = vpack.c.bf16 %v206_v15, %v206_v15 }
 0x243   :  { %567 = vmatmul.msk.bf16.vlgmr.msrb.gmra.mxu0 %vm49_vm0, %v210_v16  ;;  %568 = vmatmul.msk.bf16.vlgmr.msrb.gmra.mxu1 %vm49_vm0, %v210_v16 }
 0x244   :  { %418 = vmatpush.bf16.msrb.mxu0 %v760_v4  ;;  %431 = vmatpush.bf16.msrb.mxu1 %v762_v8 }
 0x248   :  { %419 = vmatpush.bf16.msrb.mxu0 %v765_v11  ;;  %432 = vmatpush.bf16.msrb.mxu1 %v769_v12 }
 0x24c   :  { %420 = vmatpush.bf16.msrb.mxu0 %v773_v17  ;;  %433 = vmatpush.bf16.msrb.mxu1 %v777_v18 }
 0x250   :  { %421 = vmatpush.bf16.msrb.mxu0 %v781_v23  ;;  %434 = vmatpush.bf16.msrb.mxu1 %v785_v25 }
 0x2c0   :  { %v223_v21 = vpop.f32.mrf.mxu0  ;;  %v236_v22 = vpop.f32.mrf.mxu1 }
 0x2c1   :  { %v240_v24 = vadd.f32 %v223_v21, %v208_v19  ;;  %v241_v26 = vadd.f32 %v236_v22, %v209_v20  ;;  %v358_v21 = vld [vmem:[#allocation4 + $0x50] sm:$0xff]  ;;  %v359_v22 = vld [vmem:[#allocation4 + $0x58] sm:$0xff] }
 0x2c3   :  { %610 = vtanh.f32 %v240_v24 }
 0x2c4   :  { %612 = vtanh.f32 %v241_v26 }
 0x2c8   :  { %v225_v27 = vpop.f32.mrf.mxu0  ;;  %v238_v28 = vpop.f32.mrf.mxu1 }
 0x2c9   :  { %v611_v29 = vpop.eup %610 }
 0x2ca   :  { %v613_v30 = vpop.eup %612  ;;  %v244_v31 = vmul.f32 %v611_v29, %v821_v37 }
 0x2cb   :  { %v245_v32 = vmul.f32 %v613_v30, %v823_v38 }
 0x2cc   :  { %v246_v33 = vadd.f32 %v244_v31, %v821_v37 }
 0x2cd   :  { %v247_v34 = vadd.f32 %v245_v32, %v825_v42 }
 0x2ce   :  { %v248_v36 = vmul.f32 %v246_v33, %v204_v13 }
 0x2cf   :  { %v249_v35 = vmul.f32 %v247_v34, %v246_v33 }
 0x2d1   :  { %251 = vrot.lane.b32.xlu1 %v249_v35, %s733_s0 }
 0x343   :  { %v252_v39 = vpop.permute.xlu1 %251 }
 0x344   :  { %v254_v40 = vadd.f32 %v252_v39, %v248_v36 }
 0x346   :  { %614 = vtanh.f32 %v254_v40 }
 0x34c   :  { %v615_v41 = vpop.eup %614 }
 0x34d   :  { %v256_v43 = vmul.f32 %v615_v41, %v247_v34 }
 0x34f   :  { %v260_v44 = vpack.c.bf16 %v256_v43, %v256_v43 }
 0x351   :  { %569 = vmatmul.msk.bf16.vlgmr.msrb.gmra.mxu2 %vm49_vm0, %v260_v44  ;;  %570 = vmatmul.msk.bf16.vlgmr.msrb.gmra.mxu3 %vm49_vm0, %v260_v44 }
 0x352   :  { %468 = vmatpush.bf16.msrb.mxu2 %v760_v4  ;;  %481 = vmatpush.bf16.msrb.mxu3 %v762_v8 }
 0x356   :  { %469 = vmatpush.bf16.msrb.mxu2 %v765_v11  ;;  %482 = vmatpush.bf16.msrb.mxu3 %v769_v12 }
 0x35a   :  { %470 = vmatpush.bf16.msrb.mxu2 %v773_v17  ;;  %483 = vmatpush.bf16.msrb.mxu3 %v777_v18 }
 0x35e   :  { %471 = vmatpush.bf16.msrb.mxu2 %v781_v23  ;;  %484 = vmatpush.bf16.msrb.mxu3 %v785_v25 }
 0x3d4   :  { %v273_v47 = vpop.f32.mrf.mxu2  ;;  %v286_v48 = vpop.f32.mrf.mxu3 }
 0x3d5   :  { %v290_v49 = vadd.f32 %v273_v47, %v258_v45  ;;  %v291_v4 = vadd.f32 %v286_v48, %v259_v46  ;;  %v408_v47 = vld [vmem:[#allocation4 + $0x60] sm:$0xff]  ;;  %v409_v48 = vld [vmem:[#allocation4 + $0x68] sm:$0xff] }
 0x3d7   :  { %616 = vtanh.f32 %v290_v49 }
 0x3d8   :  { %618 = vtanh.f32 %v291_v4 }
 0x3dc   :  { %v275_v8 = vpop.f32.mrf.mxu2  ;;  %v288_v11 = vpop.f32.mrf.mxu3 }
 0x3dd   :  { %v617_v50 = vpop.eup %616 }
 0x3de   :  { %v619_v12 = vpop.eup %618  ;;  %v294_v17 = vmul.f32 %v617_v50, %v821_v37 }
 0x3df   :  { %v295_v18 = vmul.f32 %v619_v12, %v823_v38 }
 0x3e0   :  { %v296_v23 = vadd.f32 %v294_v17, %v821_v37 }
 0x3e1   :  { %v297_v25 = vadd.f32 %v295_v18, %v825_v42 }
 0x3e2   :  { %v298_v52 = vmul.f32 %v296_v23, %v254_v40 }
 0x3e3   :  { %v299_v51 = vmul.f32 %v297_v25, %v296_v23 }
 0x3e5   :  { %301 = vrot.lane.b32.xlu1 %v299_v51, %s733_s0 }
 0x457   :  { %v302_v53 = vpop.permute.xlu1 %301 }
 0x458   :  { %v304_v54 = vadd.f32 %v302_v53, %v298_v52 }
 0x45a   :  { %620 = vtanh.f32 %v304_v54 }
 0x460   :  { %v621_v55 = vpop.eup %620 }
 0x461   :  { %v306_v56 = vmul.f32 %v621_v55, %v297_v25 }
 0x463   :  { %v310_v57 = vpack.c.bf16 %v306_v56, %v306_v56 }
 0x465   :  { %571 = vmatmul.msk.bf16.vlgmr.msra.gmra.mxu0 %vm49_vm0, %v310_v57  ;;  %572 = vmatmul.msk.bf16.vlgmr.msra.gmra.mxu1 %vm49_vm0, %v310_v57 }
 0x4e2   :  { %v323_v60 = vpop.f32.mrf.mxu0  ;;  %v336_v61 = vpop.f32.mrf.mxu1 }
 0x4e3   :  { %v340_v62 = vadd.f32 %v323_v60, %v308_v58  ;;  %v341_v63 = vadd.f32 %v336_v61, %v309_v59  ;;  %v458_v60 = vld [vmem:[#allocation4 + $0x70] sm:$0xff]  ;;  %v459_v61 = vld [vmem:[#allocation4 + $0x78] sm:$0xff] }
 0x4e5   :  { %622 = vtanh.f32 %v340_v62 }
 0x4e6   :  { %624 = vtanh.f32 %v341_v63 }
 0x4ea   :  { %v325_v0 = vpop.f32.mrf.mxu0  ;;  %v338_v1 = vpop.f32.mrf.mxu1 }
 0x4eb   :  { %v623_v2 = vpop.eup %622 }
 0x4ec   :  { %v625_v3 = vpop.eup %624  ;;  %v344_v5 = vmul.f32 %v623_v2, %v821_v37 }
 0x4ed   :  { %v345_v6 = vmul.f32 %v625_v3, %v823_v38 }
 0x4ee   :  { %v346_v7 = vadd.f32 %v344_v5, %v821_v37 }
 0x4ef   :  { %v347_v9 = vadd.f32 %v345_v6, %v825_v42 }
 0x4f0   :  { %v348_v13 = vmul.f32 %v346_v7, %v304_v54 }
 0x4f1   :  { %v349_v10 = vmul.f32 %v347_v9, %v346_v7 }
 0x4f3   :  { %351 = vrot.lane.b32.xlu2 %v349_v10, %s733_s0 }
 0x54d   :  { %v352_v14 = vpop.permute.xlu2 %351 }
 0x54e   :  { %v354_v15 = vadd.f32 %v352_v14, %v348_v13 }
 0x550   :  { %626 = vtanh.f32 %v354_v15 }
 0x556   :  { %v627_v16 = vpop.eup %626 }
 0x557   :  { %v356_v19 = vmul.f32 %v627_v16, %v347_v9 }
 0x559   :  { %v360_v20 = vpack.c.bf16 %v356_v19, %v356_v19 }
 0x55b   :  { %573 = vmatmul.msk.bf16.vlgmr.msra.gmra.mxu2 %vm49_vm0, %v360_v20  ;;  %574 = vmatmul.msk.bf16.vlgmr.msra.gmra.mxu3 %vm49_vm0, %v360_v20 }
 0x5de   :  { %v373_v24 = vpop.f32.mrf.mxu2  ;;  %v386_v26 = vpop.f32.mrf.mxu3 }
 0x5df   :  { %v390_v27 = vadd.f32 %v373_v24, %v358_v21  ;;  %v391_v28 = vadd.f32 %v386_v26, %v359_v22 }
 0x5e1   :  { %628 = vtanh.f32 %v390_v27 }
 0x5e2   :  { %630 = vtanh.f32 %v391_v28 }
 0x5e6   :  { %v375_v29 = vpop.f32.mrf.mxu2  ;;  %v388_v30 = vpop.f32.mrf.mxu3 }
 0x5e7   :  { %v629_v31 = vpop.eup %628 }
 0x5e8   :  { %v631_v32 = vpop.eup %630  ;;  %v394_v33 = vmul.f32 %v629_v31, %v821_v37 }
 0x5e9   :  { %v395_v34 = vmul.f32 %v631_v32, %v823_v38 }
 0x5ea   :  { %v396_v35 = vadd.f32 %v394_v33, %v821_v37 }
 0x5eb   :  { %v397_v36 = vadd.f32 %v395_v34, %v825_v42 }
 0x5ec   :  { %v398_v40 = vmul.f32 %v396_v35, %v354_v15 }
 0x5ed   :  { %v399_v39 = vmul.f32 %v397_v36, %v396_v35 }
 0x5ef   :  { %401 = vrot.lane.b32.xlu2 %v399_v39, %s733_s0 }
 0x649   :  { %v402_v41 = vpop.permute.xlu2 %401 }
 0x64a   :  { %v404_v43 = vadd.f32 %v402_v41, %v398_v40 }
 0x64c   :  { %632 = vtanh.f32 %v404_v43 }
 0x652   :  { %v633_v44 = vpop.eup %632 }
 0x653   :  { %v406_v45 = vmul.f32 %v633_v44, %v397_v36 }
 0x655   :  { %v410_v46 = vpack.c.bf16 %v406_v45, %v406_v45 }
 0x657   :  { %575 = vmatmul.msk.bf16.vlgmr.msrb.gmra.mxu0 %vm49_vm0, %v410_v46  ;;  %576 = vmatmul.msk.bf16.vlgmr.msrb.gmra.mxu1 %vm49_vm0, %v410_v46 }
 0x6d4   :  { %v423_v49 = vpop.f32.mrf.mxu0  ;;  %v436_v4 = vpop.f32.mrf.mxu1 }
 0x6d5   :  { %v440_v8 = vadd.f32 %v423_v49, %v408_v47  ;;  %v441_v11 = vadd.f32 %v436_v4, %v409_v48 }
 0x6d7   :  { %634 = vtanh.f32 %v440_v8 }
 0x6d8   :  { %636 = vtanh.f32 %v441_v11 }
 0x6dc   :  { %v425_v50 = vpop.f32.mrf.mxu0  ;;  %v438_v12 = vpop.f32.mrf.mxu1 }
 0x6dd   :  { %v635_v17 = vpop.eup %634 }
 0x6de   :  { %v637_v18 = vpop.eup %636  ;;  %v444_v23 = vmul.f32 %v635_v17, %v821_v37 }
 0x6df   :  { %v445_v25 = vmul.f32 %v637_v18, %v823_v38 }
 0x6e0   :  { %v446_v51 = vadd.f32 %v444_v23, %v821_v37 }
 0x6e1   :  { %v447_v52 = vadd.f32 %v445_v25, %v825_v42 }
 0x6e2   :  { %v448_v54 = vmul.f32 %v446_v51, %v404_v43 }
 0x6e3   :  { %v449_v53 = vmul.f32 %v447_v52, %v446_v51 }
 0x6e5   :  { %451 = vrot.lane.b32.xlu0 %v449_v53, %s733_s0 }
 0x757   :  { %v452_v55 = vpop.permute.xlu0 %451 }
 0x758   :  { %v454_v56 = vadd.f32 %v452_v55, %v448_v54 }
 0x75a   :  { %638 = vtanh.f32 %v454_v56 }
 0x760   :  { %v639_v57 = vpop.eup %638 }
 0x761   :  { %v456_v58 = vmul.f32 %v639_v57, %v447_v52 }
 0x763   :  { %v460_v59 = vpack.c.bf16 %v456_v58, %v456_v58 }
 0x765   :  { %577 = vmatmul.msk.bf16.vlgmr.msrb.gmra.mxu2 %vm49_vm0, %v460_v59  ;;  %578 = vmatmul.msk.bf16.vlgmr.msrb.gmra.mxu3 %vm49_vm0, %v460_v59 }
 0x7e8   :  { %v473_v62 = vpop.f32.mrf.mxu2  ;;  %v486_v63 = vpop.f32.mrf.mxu3 }
 0x7e9   :  { %v490_v0 = vadd.f32 %v473_v62, %v458_v60  ;;  %v491_v1 = vadd.f32 %v486_v63, %v459_v61 }
 0x7eb   :  { %640 = vtanh.f32 %v490_v0 }
 0x7ec   :  { %642 = vtanh.f32 %v491_v1 }
 0x7f0   :  { %v475_v2 = vpop.f32.mrf.mxu2  ;;  %v488_v3 = vpop.f32.mrf.mxu3 }
 0x7f1   :  { %v641_v5 = vpop.eup %640 }
 0x7f2   :  { %v643_v6 = vpop.eup %642  ;;  %v494_v7 = vmul.f32 %v641_v5, %v821_v37 }
 0x7f3   :  { %v495_v9 = vmul.f32 %v643_v6, %v823_v38 }
 0x7f4   :  { %v496_v10 = vadd.f32 %v494_v7, %v821_v37 }
 0x7f5   :  { %v497_v13 = vadd.f32 %v495_v9, %v825_v42 }
 0x7f6   :  { %v498_v15 = vmul.f32 %v496_v10, %v454_v56 }
 0x7f7   :  { %v499_v14 = vmul.f32 %v497_v13, %v496_v10 }
 0x7f9   :  { %501 = vrot.lane.b32.xlu1 %v499_v14, %s733_s0 }
 0x86b   :  { %v502_v16 = vpop.permute.xlu1 %501 }
 0x86c   :  { %v504_v19 = vadd.f32 %v502_v16, %v498_v15 }
 0x86e   :  { %644 = vtanh.f32 %v504_v19  ;;  %508 = vst.msk [vmem:[#allocation3] sm:$0xff] %vm49_vm0, %v504_v19 }
 0x874   :  { %v645_v38 = vpop.eup %644 }
 0x875   :  { %v506_v20 = vmul.f32 %v645_v38, %v497_v13 }
 0x877   :  { %507 = vst.msk [vmem:[#allocation2] sm:$0xff] %vm49_vm0, %v506_v20 }
 0x878   :  { %512 = vst.msk [vmem:[#allocation9] sm:$0xff] %vm49_vm0, %v506_v20 }
 0x879   :  { %523 = dma.vmem_to_hbm [thread:$0]  %s519_s23, 128, %s521_s26, [#allocation6]  }
 0x87a   :  { %722 = dma.done.wait [#allocation6], 128  }
 0x87b   :  { %723 = vsyncadd [#allocation6], 4294967168 }
 0x87c   :  { %528 = vsyncpa [#allocation5], 1 }
 0x87d   :  { %529 = vsyncpa [#allocation8], 1 }
 0x87e   :  { %530 = vsyncpa [#allocation6], 1 }

</bundles_post_ra>
